<compile_context>
chip_gen: v7x
topology: tpu7x:2x2x1
jax: 0.10.0
libtpu: 0.0.40
codegen_flags: <defaults>
</compile_context>

<pallas_src>
import jax
import jax.numpy as jnp
from jax.experimental import pallas as pl
from jax.experimental.pallas import tpu as pltpu


_LANES = 128
_SUBLANES = 8


def _cdiv(a, b):
    return -(-a // b)


def _default_tile_rows():
    """Per-generation target tile height (rows of 128 f32 lanes)."""
    try:
        kind = jax.devices()[0].device_kind.lower()
    except Exception:
        kind = ""
    if "v6" in kind or "v7" in kind or "7x" in kind:
        # 8192 * 128 * 4 B = 4 MiB per input per step;
        # 3 inputs x 2 pipeline buffers = 24 MiB (fits v7x 64 MiB physical VMEM).
        return 8192
    # v5e / unknown: keep the double-buffered footprint ~12 MiB.
    return 4096


def _sum_squared_errors(rgb_fine, rgb_coarse, rgb, tile_rows_target=None):
    """Returns (sum((fine-rgb)^2), sum((coarse-rgb)^2)) as f32 scalars."""
    assert rgb_fine.shape == rgb.shape and rgb_coarse.shape == rgb.shape
    total = int(rgb.size)
    itemsize = jnp.dtype(rgb.dtype).itemsize

    if tile_rows_target is None:
        tile_rows_target = _default_tile_rows()

    # ---- lane-dense layout ---------------------------------------------------
    # Flatten (free for contiguous arrays) and view as (rows, 128).  A pad copy
    # happens only when total % 128 != 0 (<=127 zeros); tiny inputs are padded
    # to >= 8 rows so the (8,128)-aligned block start always lies in bounds.
    pad = (-total) % _LANES
    rows = (total + pad) // _LANES
    if rows < _SUBLANES:
        pad += (_SUBLANES - rows) * _LANES
        rows = _SUBLANES

    def prep(x):
        flat = x.reshape(-1)
        if pad:
            # Identical zero padding on all three arrays -> diff of pads = 0.
            flat = jnp.pad(flat, (0, pad))
        return flat.reshape(rows, _LANES)

    fine2d = prep(rgb_fine)
    coarse2d = prep(rgb_coarse)
    rgb2d = prep(rgb)

    # ---- tiling ----------------------------------------------------------------
    tile_rows = min(int(tile_rows_target), rows)
    tile_rows = max(_SUBLANES, (tile_rows // _SUBLANES) * _SUBLANES)
    num_blocks = _cdiv(rows, tile_rows)
    num_splits = 2 if num_blocks >= 2 else 1   # leading "parallel" axis (megacore)
    tiles_per_split = _cdiv(num_blocks, num_splits)
    last_block = num_blocks - 1

    # ---- kernel ---------------------------------------------------------------
    def kernel(fine_ref, coarse_ref, rgb_ref, fine_out, coarse_out,
               fine_acc, coarse_acc):
        split = pl.program_id(0)
        step = pl.program_id(1)

        @pl.when(step == 0)
        def _():
            fine_acc[...] = jnp.zeros_like(fine_acc)
            coarse_acc[...] = jnp.zeros_like(coarse_acc)

        rgb_v = rgb_ref[...].astype(jnp.float32)
        sq_f = jnp.square(fine_ref[...].astype(jnp.float32) - rgb_v)
        sq_c = jnp.square(coarse_ref[...].astype(jnp.float32) - rgb_v)

        # Fold the (tile_rows, 128) tile into one (8, 128) vreg: pure VPU adds,
        # no cross-lane/sublane movement.
        def accumulate(sf, sc):
            fine_acc[...] += sf.reshape(
                tile_rows // _SUBLANES, _SUBLANES, _LANES).sum(axis=0)
            coarse_acc[...] += sc.reshape(
                tile_rows // _SUBLANES, _SUBLANES, _LANES).sum(axis=0)

        row0 = (split * tiles_per_split + step) * tile_rows
        is_full = row0 + tile_rows <= rows

        @pl.when(is_full)
        def _():
            accumulate(sq_f, sq_c)

        # Ragged last tile (and the clamped duplicate block when the block
        # count is odd): zero the *squared diffs* of out-of-range rows.
        @pl.when(jnp.logical_not(is_full))
        def _():
            grow = row0 + jax.lax.broadcasted_iota(
                jnp.int32, (tile_rows, _LANES), 0)
            valid = grow < rows
            accumulate(jnp.where(valid, sq_f, 0.0),
                       jnp.where(valid, sq_c, 0.0))

        # Single tiny XLU reduction per split, on the final grid step only.
        @pl.when(step == tiles_per_split - 1)
        def _():
            fine_out[...] = jnp.sum(fine_acc[...]).reshape(1, 1, 1)
            coarse_out[...] = jnp.sum(coarse_acc[...]).reshape(1, 1, 1)

    # ---- specs ------------------------------------------------------------------
    if num_splits * tiles_per_split == num_blocks:
        def in_map(c, i):
            return (c * tiles_per_split + i, 0)
    else:
        # Odd block count: the very last grid step of split 1 would index a
        # fully out-of-bounds block; clamp it to the last real block (its
        # contribution is fully masked out in the kernel).
        def in_map(c, i):
            return (jnp.minimum(c * tiles_per_split + i, last_block), 0)

    in_spec = pl.BlockSpec((tile_rows, _LANES), in_map)
    out_spec = pl.BlockSpec((1, 1, 1), lambda c, i: (c, 0, 0))

    tile_bytes_f32 = tile_rows * _LANES * 4
    vmem_limit = int(min(48 << 20, max(24 << 20, 8 * tile_bytes_f32 + (4 << 20))))

    cost = pl.CostEstimate(
        flops=6 * total,
        transcendentals=0,
        bytes_accessed=3 * total * itemsize + 2 * num_splits * 4,
    )

    fine_part, coarse_part = pl.pallas_call(
        kernel,
        out_shape=(
            jax.ShapeDtypeStruct((num_splits, 1, 1), jnp.float32),
            jax.ShapeDtypeStruct((num_splits, 1, 1), jnp.float32),
        ),
        grid_spec=pltpu.PrefetchScalarGridSpec(
            num_scalar_prefetch=0,
            grid=(num_splits, tiles_per_split),
            in_specs=[in_spec, in_spec, in_spec],
            out_specs=[out_spec, out_spec],
            scratch_shapes=[pltpu.VMEM((_SUBLANES, _LANES), jnp.float32)] * 2,
        ),
        compiler_params=pltpu.CompilerParams(
            dimension_semantics=("parallel", "arbitrary"),
            vmem_limit_bytes=vmem_limit,
        ),
        cost_estimate=cost,
    )(fine2d, coarse2d, rgb2d)

    # Sum the per-core partials (at most 2 scalars) on the host graph side.
    return jnp.sum(fine_part), jnp.sum(coarse_part)


def network_wrapper_forward(output, batch):
    """JAX/Pallas equivalent of NetworkWrapper.forward.

    `output` is the dict the wrapped net would produce ({'rgb_fine','rgb_coarse'});
    `batch` holds the ground-truth {'rgb'}.  bf16 predictions are accepted and
    upcast inside the kernel.
    """
    # TODO(synk): self.net architecture is not specified in the module; the
    # net's predictions are taken as inputs rather than recomputed here.
    rgb_fine = output["rgb_fine"]
    rgb_coarse = output["rgb_coarse"]
    rgb = batch["rgb"]

    n_elems = jnp.float32(rgb.size)
    fine_sse, coarse_sse = _sum_squared_errors(rgb_fine, rgb_coarse, rgb)

    color_fine_loss = fine_sse / n_elems
    color_coarse_loss = coarse_sse / n_elems
    loss = color_fine_loss + color_coarse_loss

    ln10 = jnp.log(jnp.float32(10.0))
    psnr_fine = -10.0 * jnp.log(jax.lax.stop_gradient(color_fine_loss)) / ln10
    psnr_coarse = -10.0 * jnp.log(jax.lax.stop_gradient(color_coarse_loss)) / ln10

    scalar_stats = {
        "color_fine_mse": color_fine_loss,
        "color_coarse_mse": color_coarse_loss,
        "psnr_fine": psnr_fine,
        "psnr_coarse": psnr_coarse,
        "total_loss": loss,
    }
    image_stats = {}
    return output, loss, scalar_stats, image_stats


if __name__ == "__main__":
    key = jax.random.PRNGKey(0)
    k1, k2, k3 = jax.random.split(key, 3)

    # Case 1: default tiling.  512 rays x 3 -> rows=12: one full 8-row block
    # plus one masked ragged block, exercising both kernel paths and the split.
    n_rays, n_ch = 512, 3
    rgb = jax.random.uniform(k1, (n_rays, n_ch), dtype=jnp.float32)
    rgb_fine = rgb + 0.01 * jax.random.normal(k2, (n_rays, n_ch), dtype=jnp.float32)
    rgb_coarse = rgb + 0.05 * jax.random.normal(k3, (n_rays, n_ch), dtype=jnp.float32)

    output = {"rgb_fine": rgb_fine, "rgb_coarse": rgb_coarse}
    batch = {"rgb": rgb}

    out, loss, scalar_stats, image_stats = network_wrapper_forward(output, batch)
    jax.block_until_ready(loss)
    jax.block_until_ready(scalar_stats)

    ref_fine = jnp.mean((rgb_fine - rgb) ** 2)
    ref_coarse = jnp.mean((rgb_coarse - rgb) ** 2)
    assert jnp.allclose(scalar_stats["color_fine_mse"], ref_fine, rtol=1e-5, atol=1e-7)
    assert jnp.allclose(scalar_stats["color_coarse_mse"], ref_coarse, rtol=1e-5, atol=1e-7)
    assert jnp.allclose(loss, ref_fine + ref_coarse, rtol=1e-5, atol=1e-7)
    ref_psnr_fine = -10.0 * jnp.log(ref_fine) / jnp.log(10.0)
    assert jnp.allclose(scalar_stats["psnr_fine"], ref_psnr_fine, rtol=1e-5, atol=1e-5)

    # Case 2: ragged element count (3000 % 128 != 0) with a forced tiny tile so
    # the multi-block path, the odd-block-count clamped duplicate block, and
    # the in-kernel mask all execute on small data.
    k4, k5, k6 = jax.random.split(jax.random.PRNGKey(1), 3)
    rgb2 = jax.random.uniform(k4, (1000, 3), dtype=jnp.float32)
    fine2 = rgb2 + 0.02 * jax.random.normal(k5, (1000, 3), dtype=jnp.float32)
    coarse2 = rgb2 + 0.03 * jax.random.normal(k6, (1000, 3), dtype=jnp.float32)
    sse_f, sse_c = _sum_squared_errors(fine2, coarse2, rgb2, tile_rows_target=8)
    jax.block_until_ready((sse_f, sse_c))
    assert jnp.allclose(sse_f, jnp.sum((fine2 - rgb2) ** 2), rtol=1e-5, atol=1e-5)
    assert jnp.allclose(sse_c, jnp.sum((coarse2 - rgb2) ** 2), rtol=1e-5, atol=1e-5)

    print("KERNEL_OK")
</pallas_src>

<mosaic_0001>
module attributes {stable_mosaic.version = 11 : i64} {
  func.func @kernel(%arg0: i32, %arg1: i32, %arg2: memref<8x128xf32, #tpu.memory_space<vmem>>, %arg3: memref<8x128xf32, #tpu.memory_space<vmem>>, %arg4: memref<8x128xf32, #tpu.memory_space<vmem>>, %arg5: memref<1x1x1xf32, #tpu.memory_space<vmem>>, %arg6: memref<1x1x1xf32, #tpu.memory_space<vmem>>, %arg7: memref<8x128xf32, #tpu.memory_space<vmem>>, %arg8: memref<8x128xf32, #tpu.memory_space<vmem>>) attributes {dimension_semantics = [#tpu.dimension_semantics<parallel>, #tpu.dimension_semantics<arbitrary>], iteration_bounds = array<i64: 2, 1>, scalar_prefetch = 0 : i64, scratch_operands = 2 : i64, tpu.core_type = #tpu.core_type<tc>, window_params = [{transform_indices = @transform_0, window_bounds = array<i64: 8, 128>}, {transform_indices = @transform_1, window_bounds = array<i64: 8, 128>}, {transform_indices = @transform_2, window_bounds = array<i64: 8, 128>}, {transform_indices = @transform_3, window_bounds = array<i64: 1, 1, 1>}, {transform_indices = @transform_4, window_bounds = array<i64: 1, 1, 1>}]} {
    %c0_i32 = arith.constant 0 : i32
    %0 = arith.cmpi eq, %arg1, %c0_i32 : i32
    %1 = arith.extui %0 : i1 to i32
    %c0_i32_0 = arith.constant 0 : i32
    %2 = arith.cmpi ne, %1, %c0_i32_0 : i32
    scf.if %2 {
      %cst = arith.constant 0.000000e+00 : f32
      %23 = vector.broadcast %cst : f32 to vector<8x128xf32>
      %c0_11 = arith.constant 0 : index
      %c0_12 = arith.constant 0 : index
      %24 = vector.load %arg7[%c0_11, %c0_12] : memref<8x128xf32, #tpu.memory_space<vmem>>, vector<8x128xf32>
      tpu.vector_store %arg7[%c0_11, %c0_12], %23 {strides = array<i32>} : memref<8x128xf32, #tpu.memory_space<vmem>>, vector<8x128xf32>,
      %cst_13 = arith.constant 0.000000e+00 : f32
      %25 = vector.broadcast %cst_13 : f32 to vector<8x128xf32>
      %c0_14 = arith.constant 0 : index
      %c0_15 = arith.constant 0 : index
      %26 = vector.load %arg8[%c0_14, %c0_15] : memref<8x128xf32, #tpu.memory_space<vmem>>, vector<8x128xf32>
      tpu.vector_store %arg8[%c0_14, %c0_15], %25 {strides = array<i32>} : memref<8x128xf32, #tpu.memory_space<vmem>>, vector<8x128xf32>,
    } else {
    }
    %c0 = arith.constant 0 : index
    %c0_1 = arith.constant 0 : index
    %3 = vector.load %arg4[%c0, %c0_1] : memref<8x128xf32, #tpu.memory_space<vmem>>, vector<8x128xf32>
    %c0_2 = arith.constant 0 : index
    %c0_3 = arith.constant 0 : index
    %4 = vector.load %arg2[%c0_2, %c0_3] : memref<8x128xf32, #tpu.memory_space<vmem>>, vector<8x128xf32>
    %5 = arith.subf %4, %3 : vector<8x128xf32>
    %6 = arith.mulf %5, %5 : vector<8x128xf32>
    %c0_4 = arith.constant 0 : index
    %c0_5 = arith.constant 0 : index
    %7 = vector.load %arg3[%c0_4, %c0_5] : memref<8x128xf32, #tpu.memory_space<vmem>>, vector<8x128xf32>
    %8 = arith.subf %7, %3 : vector<8x128xf32>
    %9 = arith.mulf %8, %8 : vector<8x128xf32>
    %c1_i32 = arith.constant 1 : i32
    %10 = arith.muli %arg0, %c1_i32 : i32
    %11 = arith.addi %10, %arg1 : i32
    %c8_i32 = arith.constant 8 : i32
    %12 = arith.muli %11, %c8_i32 : i32
    %c8_i32_6 = arith.constant 8 : i32
    %13 = arith.addi %12, %c8_i32_6 : i32
    %c12_i32 = arith.constant 12 : i32
    %14 = arith.cmpi sle, %13, %c12_i32 : i32
    %15 = arith.extui %14 : i1 to i32
    %c0_i32_7 = arith.constant 0 : i32
    %16 = arith.cmpi ne, %15, %c0_i32_7 : i32
    scf.if %16 {
      %c0_11 = arith.constant 0 : index
      %c0_12 = arith.constant 0 : index
      %23 = vector.load %arg7[%c0_11, %c0_12] : memref<8x128xf32, #tpu.memory_space<vmem>>, vector<8x128xf32>
      %24 = vector.shape_cast %6 : vector<8x128xf32> to vector<1x8x128xf32>
      %cst = arith.constant dense<0.000000e+00> : vector<8x128xf32>
      %25 = vector.multi_reduction <add>, %24, %cst [0] : vector<1x8x128xf32> to vector<8x128xf32>
      %26 = arith.addf %23, %25 : vector<8x128xf32>
      %c0_13 = arith.constant 0 : index
      %c0_14 = arith.constant 0 : index
      %27 = vector.load %arg7[%c0_13, %c0_14] : memref<8x128xf32, #tpu.memory_space<vmem>>, vector<8x128xf32>
      tpu.vector_store %arg7[%c0_13, %c0_14], %26 {strides = array<i32>} : memref<8x128xf32, #tpu.memory_space<vmem>>, vector<8x128xf32>,
      %c0_15 = arith.constant 0 : index
      %c0_16 = arith.constant 0 : index
      %28 = vector.load %arg8[%c0_15, %c0_16] : memref<8x128xf32, #tpu.memory_space<vmem>>, vector<8x128xf32>
      %29 = vector.shape_cast %9 : vector<8x128xf32> to vector<1x8x128xf32>
      %cst_17 = arith.constant dense<0.000000e+00> : vector<8x128xf32>
      %30 = vector.multi_reduction <add>, %29, %cst_17 [0] : vector<1x8x128xf32> to vector<8x128xf32>
      %31 = arith.addf %28, %30 : vector<8x128xf32>
      %c0_18 = arith.constant 0 : index
      %c0_19 = arith.constant 0 : index
      %32 = vector.load %arg8[%c0_18, %c0_19] : memref<8x128xf32, #tpu.memory_space<vmem>>, vector<8x128xf32>
      tpu.vector_store %arg8[%c0_18, %c0_19], %31 {strides = array<i32>} : memref<8x128xf32, #tpu.memory_space<vmem>>, vector<8x128xf32>,
    } else {
    }
    %true = arith.constant true
    %17 = arith.xori %14, %true : i1
    %18 = arith.extui %17 : i1 to i32
    %c0_i32_8 = arith.constant 0 : i32
    %19 = arith.cmpi ne, %18, %c0_i32_8 : i32
    scf.if %19 {
      %23 = tpu.iota {dimensions = array<i32: 0>} : vector<8x128xi32>
      %24 = vector.broadcast %12 : i32 to vector<8x128xi32>
      %25 = arith.addi %24, %23 : vector<8x128xi32>
      %c12_i32_11 = arith.constant 12 : i32
      %26 = vector.broadcast %c12_i32_11 : i32 to vector<8x128xi32>
      %27 = arith.cmpi slt, %25, %26 : vector<8x128xi32>
      %cst = arith.constant 0.000000e+00 : f32
      %28 = vector.broadcast %cst : f32 to vector<8x128xf32>
      %29 = arith.select %27, %6, %28 : vector<8x128xi1>, vector<8x128xf32>
      %cst_12 = arith.constant 0.000000e+00 : f32
      %30 = vector.broadcast %cst_12 : f32 to vector<8x128xf32>
      %31 = arith.select %27, %9, %30 : vector<8x128xi1>, vector<8x128xf32>
      %c0_13 = arith.constant 0 : index
      %c0_14 = arith.constant 0 : index
      %32 = vector.load %arg7[%c0_13, %c0_14] : memref<8x128xf32, #tpu.memory_space<vmem>>, vector<8x128xf32>
      %33 = vector.shape_cast %29 : vector<8x128xf32> to vector<1x8x128xf32>
      %cst_15 = arith.constant dense<0.000000e+00> : vector<8x128xf32>
      %34 = vector.multi_reduction <add>, %33, %cst_15 [0] : vector<1x8x128xf32> to vector<8x128xf32>
      %35 = arith.addf %32, %34 : vector<8x128xf32>
      %c0_16 = arith.constant 0 : index
      %c0_17 = arith.constant 0 : index
      %36 = vector.load %arg7[%c0_16, %c0_17] : memref<8x128xf32, #tpu.memory_space<vmem>>, vector<8x128xf32>
      tpu.vector_store %arg7[%c0_16, %c0_17], %35 {strides = array<i32>} : memref<8x128xf32, #tpu.memory_space<vmem>>, vector<8x128xf32>,
      %c0_18 = arith.constant 0 : index
      %c0_19 = arith.constant 0 : index
      %37 = vector.load %arg8[%c0_18, %c0_19] : memref<8x128xf32, #tpu.memory_space<vmem>>, vector<8x128xf32>
      %38 = vector.shape_cast %31 : vector<8x128xf32> to vector<1x8x128xf32>
      %cst_20 = arith.constant dense<0.000000e+00> : vector<8x128xf32>
      %39 = vector.multi_reduction <add>, %38, %cst_20 [0] : vector<1x8x128xf32> to vector<8x128xf32>
      %40 = arith.addf %37, %39 : vector<8x128xf32>
      %c0_21 = arith.constant 0 : index
      %c0_22 = arith.constant 0 : index
      %41 = vector.load %arg8[%c0_21, %c0_22] : memref<8x128xf32, #tpu.memory_space<vmem>>, vector<8x128xf32>
      tpu.vector_store %arg8[%c0_21, %c0_22], %40 {strides = array<i32>} : memref<8x128xf32, #tpu.memory_space<vmem>>, vector<8x128xf32>,
    } else {
    }
    %c0_i32_9 = arith.constant 0 : i32
    %20 = arith.cmpi eq, %arg1, %c0_i32_9 : i32
    %21 = arith.extui %20 : i1 to i32
    %c0_i32_10 = arith.constant 0 : i32
    %22 = arith.cmpi ne, %21, %c0_i32_10 : i32
    scf.if %22 {
      %c0_11 = arith.constant 0 : index
      %c0_12 = arith.constant 0 : index
      %23 = vector.load %arg7[%c0_11, %c0_12] : memref<8x128xf32, #tpu.memory_space<vmem>>, vector<8x128xf32>
      %24 = vector.shape_cast %23 : vector<8x128xf32> to vector<1x8x128xf32>
      %cst = arith.constant dense<0.000000e+00> : vector<1xf32>
      %25 = vector.multi_reduction <add>, %24, %cst [1, 2] : vector<1x8x128xf32> to vector<1xf32>
      %26 = vector.shape_cast %25 : vector<1xf32> to vector<1x1x1xf32>
      %27 = vector.extract %26[0, 0, 0] : f32 from vector<1x1x1xf32>
      %28 = vector.broadcast %27 : f32 to vector<1x1x1xf32>
      %c0_13 = arith.constant 0 : index
      %c0_14 = arith.constant 0 : index
      %c0_15 = arith.constant 0 : index
      %29 = vector.load %arg5[%c0_13, %c0_14, %c0_15] : memref<1x1x1xf32, #tpu.memory_space<vmem>>, vector<1x1x1xf32>
      tpu.vector_store %arg5[%c0_13, %c0_14, %c0_15], %28 {strides = array<i32>} : memref<1x1x1xf32, #tpu.memory_space<vmem>>, vector<1x1x1xf32>,
      %c0_16 = arith.constant 0 : index
      %c0_17 = arith.constant 0 : index
      %30 = vector.load %arg8[%c0_16, %c0_17] : memref<8x128xf32, #tpu.memory_space<vmem>>, vector<8x128xf32>
      %31 = vector.shape_cast %30 : vector<8x128xf32> to vector<1x8x128xf32>
      %cst_18 = arith.constant dense<0.000000e+00> : vector<1xf32>
      %32 = vector.multi_reduction <add>, %31, %cst_18 [1, 2] : vector<1x8x128xf32> to vector<1xf32>
      %33 = vector.shape_cast %32 : vector<1xf32> to vector<1x1x1xf32>
      %34 = vector.extract %33[0, 0, 0] : f32 from vector<1x1x1xf32>
      %35 = vector.broadcast %34 : f32 to vector<1x1x1xf32>
      %c0_19 = arith.constant 0 : index
      %c0_20 = arith.constant 0 : index
      %c0_21 = arith.constant 0 : index
      %36 = vector.load %arg6[%c0_19, %c0_20, %c0_21] : memref<1x1x1xf32, #tpu.memory_space<vmem>>, vector<1x1x1xf32>
      tpu.vector_store %arg6[%c0_19, %c0_20, %c0_21], %35 {strides = array<i32>} : memref<1x1x1xf32, #tpu.memory_space<vmem>>, vector<1x1x1xf32>,
    } else {
    }
    return
  }
  func.func @transform_0(%arg0: i32, %arg1: i32) -> (i32, i32) {
    %c1_i32 = arith.constant 1 : i32
    %0 = arith.muli %arg0, %c1_i32 : i32
    %1 = arith.addi %0, %arg1 : i32
    %c0_i32 = arith.constant 0 : i32
    %c0_i32_0 = arith.constant 0 : i32
    return %1, %c0_i32 : i32, i32
  }
  func.func @transform_1(%arg0: i32, %arg1: i32) -> (i32, i32) {
    %c1_i32 = arith.constant 1 : i32
    %0 = arith.muli %arg0, %c1_i32 : i32
    %1 = arith.addi %0, %arg1 : i32
    %c0_i32 = arith.constant 0 : i32
    %c0_i32_0 = arith.constant 0 : i32
    return %1, %c0_i32 : i32, i32
  }
  func.func @transform_2(%arg0: i32, %arg1: i32) -> (i32, i32) {
    %c1_i32 = arith.constant 1 : i32
    %0 = arith.muli %arg0, %c1_i32 : i32
    %1 = arith.addi %0, %arg1 : i32
    %c0_i32 = arith.constant 0 : i32
    %c0_i32_0 = arith.constant 0 : i32
    return %1, %c0_i32 : i32, i32
  }
  func.func @transform_3(%arg0: i32, %arg1: i32) -> (i32, i32, i32) {
    %c0_i32 = arith.constant 0 : i32
    %c0_i32_0 = arith.constant 0 : i32
    %c0_i32_1 = arith.constant 0 : i32
    return %arg0, %c0_i32, %c0_i32_0 : i32, i32, i32
  }
  func.func @transform_4(%arg0: i32, %arg1: i32) -> (i32, i32, i32) {
    %c0_i32 = arith.constant 0 : i32
    %c0_i32_0 = arith.constant 0 : i32
    %c0_i32_1 = arith.constant 0 : i32
    return %arg0, %c0_i32, %c0_i32_0 : i32, i32, i32
  }
}

</mosaic_0001>

<bundles_post_ra>
// kernel: tpu_custom_call.1
= control target key start
LH: loop header
LB: loop body
LE: loop exit
PB: predicated region body
PF: predicated region fallthrough
CT: control target
= control target key end

     0   :  { %10 = vsyncpa [#allocation5], 0  ;;  %s1006_s0 = inlined_call_operand.hbm [shape: f32[12,128], index: 0, kind: input, shape index: {}]   ;;  %s1007_s1 = inlined_call_operand.hbm [shape: f32[12,128], index: 1, kind: input, shape index: {}]   ;;  %s1008_s2 = inlined_call_operand.hbm [shape: f32[12,128], index: 2, kind: input, shape index: {}]   ;;  %s1009_s3 = inlined_call_operand.vmem [shape: f32[2,1,1], index: 3, kind: output, shape index: {0}]   ;;  %s1010_s4 = inlined_call_operand.vmem [shape: f32[2,1,1], index: 4, kind: output, shape index: {1}]  }
   0x1   :  { %12 = vsyncpa [#allocation5 + $0x1], 0 }
   0x2   :  { %13 = vsyncpa [#allocation7], 0 }
   0x3   :  { %15 = vsyncpa [#allocation7 + $0x1], 0  ;;  %s792_s15 = smov 0   ;;  %s794_s16 = smov 0  }
   0x4   :  { %s796_s17 = smov 0   ;;  %s798_s18 = smov 0  }
   0x5   :  { %s800_s19 = smov 0   ;;  %s802_s20 = smov 0  }
   0x6 LB: > { %s1012_s21 = sadd.s32 4294967295, %s761_s20   ;;  %s33_s22 = sadd.s32 1, %s757_s19  ;;  %s761_s20 = sphi %s802_s20, %s21_s20   ;;  %s757_s19 = sphi %s800_s19, %s1029_s19   ;;  %s753_s18 = sphi %s798_s18, %s1028_s18   ;;  %s749_s17 = sphi %s796_s17, %s1027_s17   ;;  %s745_s16 = sphi %s794_s16, %s1026_s16   ;;  %s741_s15 = sphi %s792_s15, %s1025_s15  }
   0x7   : > { %p35_p0 = scmp.ge.s32.totalorder %s33_s22, 2  ;;  %s42_s23 = sadd.s32 1, %s749_s17 }
   0x8   : > { %p49_p1 = scmp.ne.s32.totalorder %s749_s17, %s745_s16  ;;  %p50_p2 = scmp.eq.s32.totalorder %s761_s20, 0 }
   0x9   : > { %s1031_s22 = smov (%p35_p0, %s33_s22), 0  ;;  %p55_p4 = scmp.ne.s32.totalorder %s745_s16, %s741_s15 }
   0xa   : > { %p51_p3 = por %p50_p2, %p49_p1  ;;  %s39_s24 = ssub.s32 %s757_s19, %s1031_s22 }
   0xb   : > { %p56_p5 = scmp.eq.s32.totalorder %s1012_s21, 0  ;;  %p40_p6 = scmp.eq.s32.totalorder %s39_s24, 0 }
   0xc   : > { %p567_p8 = scmp.lt.s32.totalorder %s761_s20, 2  ;;  %s187_s27 = sand.u32 1, %s749_s17  }
   0xd   : > { %p833_p7 = por %p56_p5, %p55_p4  ;;  %s843_s28 = sshll.u32 %s757_s19, 7 }
   0xe   : > { %s839_s26 = scalar_select %p40_p6, %s749_s17, %s42_s23  }
   0xf   : > { %s1015_s25 = scalar_select %p833_p7, 1, 0 }
  0x10   : > { %s847_s29 = sshll.u32 %s187_s27, 3  ;;  %p849_p9 = pnand %p567_p8, %p51_p3 }
  0x11   : > { %s206_s5 = sand.u32 1, %s761_s20   ;;  %s858_s8 = scalar_lea.hbm %s1007_s1, %s843_s28 }
  0x12   : > { %s1016_s30 = scalar_select %p849_p9, 1, 0 }
  0x13   : > { %s210_s9 = scalar_lea.vmem [#allocation6], %s847_s29  ;;  %s864_s11 = scalar_lea.sflag [#allocation7], %s206_s5 }
  0x14   : > { %s218_s10 = sshll.u32 %s210_s9, 4  ;;  %s617_s12 = scalar_lea.hbm %s858_s8, 128  ;;  %s861_s10 = int_to_ptr.vmem [resolvable:$true] %s218_s10 }
  0x15   : > { %p618_p11 = scmp.ne.s32.totalorder %s858_s8, %s617_s12  ;;  %p870_p12 = pneg %p849_p9 }
  0x16   : > { %s622_s23 = scalar_lea.hbm %s1007_s1, 256  ;;  %p623_p1 = scmp.lt.u32.totalorder %s858_s8, %s1007_s1 }
  0x17   : > { %p620_p13 = pnand %p870_p12, %p618_p11  ;;  %p624_p2 = scmp.lt.u32.totalorder %s622_s23, %s617_s12 }
  0x18   : > { %p626_p4 = scmp.lt.u32.totalorder %s617_s12, %s858_s8 }
  0x19   : > { %p621_p0 = pneg %p620_p13  ;;  %p625_p3 = por %p624_p2, %p623_p1 }
  0x1b   : > { %p627_p5 = por %p626_p4, %p625_p3 }
  0x1d   : > { %p628_p6 = pnand %p627_p5, %p621_p0 }
  0x1f   : > { %631 = shalt.err (!%p628_p6)
}
  0x20   : > { %s632_s5 = scalar_lea.vmem %s861_s10, 128  ;;  %s763_s7 = smov [#allocation6]  }
  0x21   : > { %p633_p8 = scmp.ne.s32.totalorder %s861_s10, %s632_s5  ;;  %s637_s9 = sshll.u32 %s763_s7, 4  ;;  %s638_s9 = int_to_ptr.vmem [resolvable:$false] %s637_s9 }
  0x22   : > { %s639_s14 = scalar_lea.vmem %s638_s9, 256  ;;  %p640_p10 = scmp.lt.s32.totalorder %s861_s10, %s638_s9 }
  0x23   : > { %p635_p11 = pnand %p633_p8, %p870_p12  ;;  %p641_p7 = scmp.lt.s32.totalorder %s639_s14, %s632_s5 }
  0x25   : > { %p636_p13 = pneg %p635_p11  ;;  %p642_p1 = por %p641_p7, %p640_p10 }
  0x27   : > { %p643_p2 = pnand %p642_p1, %p636_p13 }
  0x29   : > { %646 = shalt.err (!%p643_p2)
}
  0x2a   : > { %563 = dma.hbm_to_vmem [thread:$0]  (!%p849_p9), %s858_s8, 128, %s861_s10, %s864_s11  }
  0x2b   : > { %p242_p0 = scmp.lt.s32.totalorder %s761_s20, 3  ;;  %p1018_p3 = scmp.ge.s32.totalorder %s761_s20, 1 }
  0x2c   : > { %s905_s24 = scalar_lea.hbm %s1006_s0, %s843_s28  ;;  %s191_s6 = scalar_lea.vmem [#allocation4], %s847_s29 }
  0x2d   : > { %p897_p4 = pnand %p1018_p3, %p242_p0  ;;  %s199_s5 = sshll.u32 %s191_s6, 4  ;;  %s200_s5 = int_to_ptr.vmem [resolvable:$true] %s199_s5 }
  0x2e   : > { %s188_s8 = scalar_lea.sflag [#allocation5], %s187_s27  ;;  %s647_s10 = scalar_lea.hbm %s905_s24, 128 }
  0x2f   : > { %s1019_s12 = scalar_select %p897_p4, 1, 0 }
  0x30   : > { %p648_p7 = scmp.ne.s32.totalorder %s905_s24, %s647_s10  ;;  %s652_s14 = scalar_lea.hbm %s1006_s0, 256 }
  0x31   : > { %p653_p6 = scmp.lt.u32.totalorder %s905_s24, %s1006_s0  ;;  %p654_p8 = scmp.lt.u32.totalorder %s652_s14, %s647_s10 }
  0x32   : > { %p650_p10 = pnand %p648_p7, %p870_p12  ;;  %p656_p13 = scmp.lt.u32.totalorder %s647_s10, %s905_s24 }
  0x33   : > { %p655_p11 = por %p654_p8, %p653_p6 }
  0x34   : > { %p651_p5 = pneg %p650_p10 }
  0x35   : > { %p657_p1 = por %p656_p13, %p655_p11 }
  0x37   : > { %p658_p2 = pnand %p657_p1, %p651_p5 }
  0x39   : > { %661 = shalt.err (!%p658_p2)
}
  0x3a   : > { %s662_s27 = scalar_lea.vmem %s200_s5, 128  ;;  %s764_s6 = smov [#allocation4]  }
  0x3b   : > { %p663_p0 = scmp.ne.s32.totalorder %s200_s5, %s662_s27  ;;  %s667_s21 = sshll.u32 %s764_s6, 4  ;;  %s668_s21 = int_to_ptr.vmem [resolvable:$false] %s667_s21 }
  0x3c   : > { %s669_s7 = scalar_lea.vmem %s668_s21, 256  ;;  %p670_p10 = scmp.lt.s32.totalorder %s200_s5, %s668_s21 }
  0x3d   : > { %p665_p3 = pnand %p663_p0, %p870_p12  ;;  %p671_p4 = scmp.lt.s32.totalorder %s669_s7, %s662_s27 }
  0x3f   : > { %p666_p7 = pneg %p665_p3  ;;  %p672_p9 = por %p671_p4, %p670_p10 }
  0x41   : > { %p673_p6 = pnand %p672_p9, %p666_p7 }
  0x43   : > { %676 = shalt.err (!%p673_p6)
}
  0x44   : > { %p1020_p8 = scmp.ne.s32.totalorder %s1016_s30, 0  ;;  %s931_s14 = scalar_lea.hbm %s1008_s2, %s843_s28 }
  0x45   : > { %s229_s21 = scalar_lea.vmem [#allocation8], %s847_s29  ;;  %s677_s23 = scalar_lea.hbm %s931_s14, 128 }
  0x46   : > { %560 = dma.hbm_to_vmem [thread:$0]  (!%p1020_p8), %s905_s24, 128, %s200_s5, %s188_s8  }
  0x47   : > { %s237_s15 = sshll.u32 %s229_s21, 4  ;;  %p678_p9 = scmp.ne.s32.totalorder %s931_s14, %s677_s23  ;;  %s238_s15 = int_to_ptr.vmem [resolvable:$true] %s237_s15 }
  0x48   : > { %s682_s24 = scalar_lea.hbm %s1008_s2, 256  ;;  %p683_p11 = scmp.lt.u32.totalorder %s931_s14, %s1008_s2 }
  0x49   : > { %p680_p4 = pnand %p678_p9, %p870_p12  ;;  %p684_p13 = scmp.lt.u32.totalorder %s682_s24, %s677_s23 }
  0x4a   : > { %p686_p2 = scmp.lt.u32.totalorder %s677_s23, %s931_s14 }
  0x4b   : > { %p681_p5 = pneg %p680_p4  ;;  %p685_p1 = por %p684_p13, %p683_p11 }
  0x4d   : > { %p687_p0 = por %p686_p2, %p685_p1 }
  0x4f   : > { %p688_p3 = pnand %p687_p0, %p681_p5 }
  0x51   : > { %691 = shalt.err (!%p688_p3)
}
  0x52   : > { %s692_s28 = scalar_lea.vmem %s238_s15, 128  ;;  %s765_s29 = smov [#allocation8]  }
  0x53   : > { %p693_p7 = scmp.ne.s32.totalorder %s238_s15, %s692_s28  ;;  %s697_s7 = sshll.u32 %s765_s29, 4  ;;  %s698_s7 = int_to_ptr.vmem [resolvable:$false] %s697_s7 }
  0x54   : > { %s699_s10 = scalar_lea.vmem %s698_s7, 256  ;;  %p700_p9 = scmp.lt.s32.totalorder %s238_s15, %s698_s7 }
  0x55   : > { %p695_p10 = pnand %p693_p7, %p870_p12  ;;  %p701_p4 = scmp.lt.s32.totalorder %s699_s10, %s692_s28 }
  0x57   : > { %p696_p6 = pneg %p695_p10  ;;  %p702_p8 = por %p701_p4, %p700_p9 }
  0x59   : > { %p703_p11 = pnand %p702_p8, %p696_p6 }
  0x5b   : > { %706 = shalt.err (!%p703_p11)
}
  0x5c   : > { %p1021_p13 = scmp.ne.s32.totalorder %s1016_s30, 0  ;;  %p1022_p5 = scmp.ne.s32.totalorder %s1019_s12, 0 }
  0x5d   : > { %s248_s13 = sand.u32 (!%p1022_p5), 1, %s745_s16   ;;  %p1023_p12 = scmp.ne.s32.totalorder (!%p1022_p5), %s1015_s25, 0 }
  0x5e   : > { %566 = dma.hbm_to_vmem [thread:$0]  (!%p1021_p13), %s931_s14, 128, %s238_s15, %s864_s11  }
  0x5f   : > { %246 = sbr.rel (%p1022_p5) target bundleno = 348 (0x15c), region = 32  ;;  %s539_s9 = sshll.u32 (!%p1022_p5), %s248_s13, 3 }
  0x60   : > { %s249_s21 = scalar_lea.sflag (!%p1022_p5), [#allocation5], %s248_s13  ;;  %s252_s23 = scalar_lea.vmem (!%p1022_p5), [#allocation4], %s539_s9 }
  0x66   : > { %732 = dma.done.wait (%p1023_p12), %s249_s21, 128  }
  0x67   : > { %734 = vsyncadd (%p1023_p12), %s249_s21, 4294967168  ;;  %s1024_s27 = sadd.s32 4294967295, %s761_s20   ;;  %s261_s11 = scalar_lea.vmem [#allocation6], %s539_s9 }
  0x68   : > { %s257_s30 = sand.u32 1, %s1024_s27  }
  0x69   : > { %s258_s6 = scalar_lea.sflag [#allocation7], %s257_s30 }
  0x6a   : > { %736 = dma.done.wait (%p1023_p12), %s258_s6, 256  }
  0x6b   : > { %738 = vsyncadd (%p1023_p12), %s258_s6, 4294967040  ;;  %p309_p8 = scmp.lt.s32.totalorder %s753_s18, 1  ;;  %v766_v0 = vmov 0.0   ;;  %s542_s12 = sshll.u32 %s753_s18, 3  ;;  %v322_v2 = vld [vmem:[%s252_s23] sm:$0xff]  ;;  %v325_v3 = vld [vmem:[%s261_s11] sm:$0xff] }
  0x6c   : > { %319 = vst [vmem:[#allocation2] sm:$0xff] %v766_v0  ;;  %320 = vst [vmem:[#allocation3] sm:$0xff] %v766_v0  ;;  %s330_s14 = sadd.s32 8, %s542_s12  ;;  %s270_s29 = scalar_lea.vmem [#allocation8], %s539_s9 }
  0x6d   : > { %s1033_s18 = smov (!%p309_p8, %s753_s18), 1  ;;  %v321_v1 = vld [vmem:[%s270_s29] sm:$0xff]  ;;  %p543_p1 = scmp.gt.s32.totalorder %s330_s14, 12 }
  0x6e   : > { %s311_s5 = scalar_lea.vmem %s1009_s3, %s1033_s18  ;;  %s314_s28 = scalar_lea.vmem %s1010_s4, %s1033_s18  ;;  %v323_v4 = vsub.f32 %v322_v2, %v321_v1  ;;  %v326_v5 = vsub.f32 %v325_v3, %v321_v1 }
  0x6f   : > { %334 = sbr.rel (%p543_p1) target bundleno = 119 (0x77), region = 52 }
  0x70   : > { %v324_v6 = vmul.f32 %v323_v4, %v323_v4  ;;  %v327_v7 = vmul.f32 %v326_v5, %v326_v5 }
  0x73   : > { %v335_v8 = vld [vmem:[#allocation2] sm:$0xff] (!%p543_p1)  ;;  %v339_v9 = vld [vmem:[#allocation3] sm:$0xff] (!%p543_p1) }
  0x74   : > { %v337_v10 = vadd.f32 (!%p543_p1), %v335_v8, %v324_v6  ;;  %v341_v11 = vadd.f32 (!%p543_p1), %v339_v9, %v327_v7 }
  0x76   : > { %338 = vst [vmem:[#allocation2] sm:$0xff] %v337_v10  ;;  %342 = vst [vmem:[#allocation3] sm:$0xff] %v341_v11 }
  0x77 PF: > { %p544_p2 = scmp.le.s32.totalorder %s330_s14, 12 }
  0x78   : > { %v347_v12 = vlaneseq (!%p544_p2)  ;;  %v349_v13 = vstv (!%p544_p2), %s542_s12 }
  0x79   : > { %346 = sbr.rel (%p544_p2) target bundleno = 131 (0x83), region = 56 }
  0x7a   : > { %v348_v14 = vshrl.u32 (!%p544_p2), %v347_v12, 7 }
  0x7c   : > { %v350_v15 = vadd.s32 (!%p544_p2), %v349_v13, %v348_v14 }
  0x7d   : > { %v354_v16 = vld [vmem:[#allocation2] sm:$0xff] (!%p544_p2)  ;;  %v358_v17 = vld [vmem:[#allocation3] sm:$0xff] (!%p544_p2) }
  0x7e   : > { %vm351_vm0 = vcmp.lt.s32.totalorder (!%p544_p2), %v350_v15, 12 }
  0x7f   : > { %v352_v18 = vsel (!%p544_p2), %vm351_vm0, %v324_v6, 0.0  ;;  %v353_v19 = vsel (!%p544_p2), %vm351_vm0, %v327_v7, 0.0 }
  0x80   : > { %v356_v20 = vadd.f32 %v354_v16, %v352_v18  ;;  %v360_v21 = vadd.f32 %v358_v17, %v353_v19 }
  0x82   : > { %357 = vst [vmem:[#allocation2] sm:$0xff] %v356_v20  ;;  %361 = vst [vmem:[#allocation3] sm:$0xff] %v360_v21 }
  0x83 PF: > { %vm376_vm1 = vcmask 0  }
  0x89   : > { %v365_v22 = vld [vmem:[#allocation2] sm:$0xff]  ;;  %v378_v23 = vld [vmem:[#allocation3] sm:$0xff] }
  0x8a   : > { %366 = vadd.xlane.f32.xlu0 %v365_v22 }
  0x8e   : > { %379 = vadd.xlane.f32.xlu0 %v378_v23 }
 0x117   : > { %v367_v24 = vpop.xlane.xlu0 %366 }
 0x118   : > { %v368_v25 = vrot.slane %v367_v24, 4 }
 0x11a   : > { %v369_v26 = vadd.f32 %v368_v25, %v367_v24 }
 0x11b   : > { %v380_v27 = vpop.xlane.xlu0 %379 }
 0x11c   : > { %v370_v28 = vrot.slane %v369_v26, 2  ;;  %v381_v29 = vrot.slane %v380_v27, 4 }
 0x11e   : > { %v382_v30 = vadd.f32 %v381_v29, %v380_v27  ;;  %v371_v31 = vadd.f32 %v370_v28, %v369_v26 }
 0x120   : > { %v383_v32 = vrot.slane %v382_v30, 2  ;;  %v372_v33 = vrot.slane %v371_v31, 1 }
 0x122   : > { %v384_v34 = vadd.f32 %v383_v32, %v382_v30  ;;  %v373_v35 = vadd.f32 %v372_v33, %v371_v31 }
 0x124   : > { %547 = vpush %v373_v35  ;;  %v385_v36 = vrot.slane %v384_v34, 1 }
 0x126   : > { %v386_v37 = vadd.f32 %v385_v36, %v384_v34 }
 0x128   : > { %549 = vpush %v386_v37 }
 0x155   : > { %s548_s7 = spop %547 }
 0x156   : > { %v375_v38 = vstv %s548_s7 }
 0x157   : > { %377 = vst.msk [vmem:[%s311_s5] sm:$0x1] %vm376_vm1, %v375_v38 }
 0x159   : > { %s550_s9 = spop %549 }
 0x15a   : > { %v388_v39 = vstv %s550_s9 }
 0x15b   : > { %389 = vst.msk [vmem:[%s314_s28] sm:$0x1] %vm376_vm1, %v388_v39 }
 0x15c PF: > { %s21_s20 = sadd.s32 1, %s761_s20   ;;  %s1025_s15 = smov %s745_s16 }
 0x15d   : > { %p18_p0 = scmp.ge.s32.totalorder %s21_s20, 4   ;;  %s1026_s16 = smov %s749_s17 }
 0x15e   : > { %s1027_s17 = smov %s839_s26  ;;  %s1028_s18 = smov %s757_s19 }
 0x15f   : > { %s1029_s19 = smov %s1031_s22  ;;  %20 = sbr.rel (!%p18_p0) target bundleno = 6 (0x6), region = 124 }
 0x166   :  { %419 = vsyncpa [#allocation5], 1 }
 0x167   :  { %421 = vsyncpa [#allocation5 + $0x1], 1 }
 0x168   :  { %422 = vsyncpa [#allocation7], 1 }
 0x169   :  { %424 = vsyncpa [#allocation7 + $0x1], 1 }

</bundles_post_ra>
